<compile_context>
chip_gen: v7x
topology: tpu7x:2x2x1
jax: 0.10.0
libtpu: 0.0.40
codegen_flags: <defaults>
</compile_context>

<pallas_src>
import jax
import jax.numpy as jnp
from jax.experimental import pallas as pl
from jax.experimental.pallas import tpu as pltpu

N_IN = 5     # linear0 in_features  == linear1 out_features
N_HID = 7    # linear0 out_features == linear1 in_features
LANES = 128


def mlp_kernel(w0_ref, b0_ref, w1_ref, b1_ref, x_ref, o_ref):
    # VMEM blocks:
    #   w0_ref (7, 5)   b0_ref (7, 1)   w1_ref (5, 7)   b1_ref (5, 1)
    #   x_ref  (5, tb)  feature-major (batch on the 128-lane axis)
    #   o_ref  (7, tb)
    # MXU handles the contractions (f32 accumulate); VPU does bias + relu.
    hi = jax.lax.Precision.HIGHEST
    w0 = w0_ref[...]
    b0 = b0_ref[...]
    x = x_ref[...]

    # layer 0: relu(W0 @ x + b0)   (5 -> 7)
    h0 = jnp.maximum(
        jnp.dot(w0, x, preferred_element_type=jnp.float32, precision=hi) + b0,
        0.0)
    # layer 1: relu(W1 @ h0 + b1)  (7 -> 5)
    h1 = jnp.maximum(
        jnp.dot(w1_ref[...], h0, preferred_element_type=jnp.float32,
                precision=hi) + b1_ref[...],
        0.0)
    # layer 2: relu(W0 @ h1 + b0)  shared linear0 weights (5 -> 7)
    out = jnp.maximum(
        jnp.dot(w0, h1, preferred_element_type=jnp.float32, precision=hi) + b0,
        0.0)
    o_ref[...] = out.astype(o_ref.dtype)


def _choose_batch_tile(batch, batch_tile):
    """Pick a lane-aligned batch tile (multiple of 128)."""
    n128 = pl.cdiv(batch, LANES)                      # lane-groups of work
    t128 = max(1, min(batch_tile // LANES, n128))
    if n128 >= 2:
        # v7x megacore: keep >= 2 grid steps (prefer an even count) so both
        # TensorCores get balanced work under "parallel" semantics.
        steps = max(2, pl.cdiv(n128, t128))
        if steps % 2:
            steps = min(steps + 1, n128)
        t128 = pl.cdiv(n128, steps)
    return t128 * LANES


def mlp_forward(x, w0, b0, w1, b1, *, batch_tile=32768):
    """x: (B, 5); w0: (7, 5); b0: (7,); w1: (5, 7); b1: (5,) -> (B, 7)."""
    B, f_in = x.shape
    assert f_in == N_IN

    # Feature-major activations: batch on the lane (last) axis -> dense tiles.
    xT = jnp.transpose(x)                              # (5, B)

    tb = _choose_batch_tile(B, batch_tile)
    grid = (pl.cdiv(B, tb),)

    outT = pl.pallas_call(
        mlp_kernel,
        out_shape=jax.ShapeDtypeStruct((N_HID, B), x.dtype),
        grid_spec=pltpu.PrefetchScalarGridSpec(
            num_scalar_prefetch=0,
            grid=grid,
            in_specs=[
                pl.BlockSpec((N_HID, N_IN), lambda i: (0, 0)),   # w0 (7,5)
                pl.BlockSpec((N_HID, 1), lambda i: (0, 0)),      # b0 (7,1)
                pl.BlockSpec((N_IN, N_HID), lambda i: (0, 0)),   # w1 (5,7)
                pl.BlockSpec((N_IN, 1), lambda i: (0, 0)),       # b1 (5,1)
                pl.BlockSpec((N_IN, tb), lambda i: (0, i)),      # x tile
            ],
            out_specs=pl.BlockSpec((N_HID, tb), lambda i: (0, i)),
        ),
        compiler_params=pltpu.CompilerParams(
            dimension_semantics=("parallel",),
            vmem_limit_bytes=32 * 1024 * 1024,
        ),
    )(
        w0.astype(jnp.float32),
        b0.reshape(N_HID, 1).astype(jnp.float32),
        w1.astype(jnp.float32),
        b1.reshape(N_IN, 1).astype(jnp.float32),
        xT,
    )

    return jnp.transpose(outT)                         # (B, 7)


def reference_forward(x, w0, b0, w1, b1):
    hi = jax.lax.Precision.HIGHEST
    z = jnp.maximum(jnp.dot(x, w0.T, precision=hi) + b0, 0.0)
    z = jnp.maximum(jnp.dot(z, w1.T, precision=hi) + b1, 0.0)
    z = jnp.maximum(jnp.dot(z, w0.T, precision=hi) + b0, 0.0)
    return z


if __name__ == "__main__":
    key = jax.random.PRNGKey(0)
    kx, kw0, kb0, kw1, kb1 = jax.random.split(key, 5)

    # Small batch (not a multiple of 128) exercises the ragged-tile path;
    # feature dims are fixed by the module (5 -> 7 -> 5 -> 7).
    B = 16
    x = jax.random.normal(kx, (B, N_IN), dtype=jnp.float32)

    # Deterministic init mimicking nn.Linear's uniform(+-1/sqrt(fan_in)).
    bound0 = 1.0 / jnp.sqrt(5.0)
    bound1 = 1.0 / jnp.sqrt(7.0)
    w0 = jax.random.uniform(kw0, (N_HID, N_IN), jnp.float32, -bound0, bound0)
    b0 = jax.random.uniform(kb0, (N_HID,), jnp.float32, -bound0, bound0)
    w1 = jax.random.uniform(kw1, (N_IN, N_HID), jnp.float32, -bound1, bound1)
    b1 = jax.random.uniform(kb1, (N_IN,), jnp.float32, -bound1, bound1)

    out = jax.block_until_ready(mlp_forward(x, w0, b0, w1, b1))
    ref = reference_forward(x, w0, b0, w1, b1)

    assert out.shape == (B, N_HID), out.shape
    assert jnp.allclose(out, ref, atol=1e-5, rtol=1e-5), "mismatch vs reference"

    print("KERNEL_OK")
</pallas_src>

<mosaic_0001>
module attributes {stable_mosaic.version = 11 : i64} {
  func.func @mlp_kernel(%arg0: i32, %arg1: memref<7x5xf32, #tpu.memory_space<vmem>>, %arg2: memref<7x1xf32, #tpu.memory_space<vmem>>, %arg3: memref<5x7xf32, #tpu.memory_space<vmem>>, %arg4: memref<5x1xf32, #tpu.memory_space<vmem>>, %arg5: memref<5x128xf32, #tpu.memory_space<vmem>>, %arg6: memref<7x128xf32, #tpu.memory_space<vmem>>) attributes {dimension_semantics = [#tpu.dimension_semantics<parallel>], iteration_bounds = array<i64: 1>, scalar_prefetch = 0 : i64, scratch_operands = 0 : i64, tpu.core_type = #tpu.core_type<tc>, window_params = [{pipeline_mode = #tpu.pipeline_mode<synchronous>, transform_indices = @transform_0, window_bounds = array<i64: 7, 5>}, {pipeline_mode = #tpu.pipeline_mode<synchronous>, transform_indices = @transform_1, window_bounds = array<i64: 7, 1>}, {pipeline_mode = #tpu.pipeline_mode<synchronous>, transform_indices = @transform_2, window_bounds = array<i64: 5, 7>}, {pipeline_mode = #tpu.pipeline_mode<synchronous>, transform_indices = @transform_3, window_bounds = array<i64: 5, 1>}, {transform_indices = @transform_4, window_bounds = array<i64: 5, 128>}, {transform_indices = @transform_5, window_bounds = array<i64: 7, 128>}]} {
    %c0 = arith.constant 0 : index
    %c0_0 = arith.constant 0 : index
    %0 = vector.load %arg1[%c0, %c0_0] : memref<7x5xf32, #tpu.memory_space<vmem>>, vector<7x5xf32>
    %c0_1 = arith.constant 0 : index
    %c0_2 = arith.constant 0 : index
    %1 = vector.load %arg2[%c0_1, %c0_2] : memref<7x1xf32, #tpu.memory_space<vmem>>, vector<7x1xf32>
    %c0_3 = arith.constant 0 : index
    %c0_4 = arith.constant 0 : index
    %2 = vector.load %arg5[%c0_3, %c0_4] : memref<5x128xf32, #tpu.memory_space<vmem>>, vector<5x128xf32>
    %cst = arith.constant dense<0.000000e+00> : vector<7x128xf32>
    %3 = tpu.matmul %0, %2, %cst {dimension_numbers = #tpu.dot_dimension_numbers<[1], [0], [0], [1], [0, 0, 1, 1], [], []>, precision = #tpu.contract_precision<fp32>} : vector<7x5xf32>, vector<5x128xf32>, vector<7x128xf32> -> vector<7x128xf32>
    %4 = vector.broadcast %1 : vector<7x1xf32> to vector<7x128xf32>
    %5 = arith.addf %3, %4 : vector<7x128xf32>
    %cst_5 = arith.constant 0.000000e+00 : f32
    %6 = vector.broadcast %cst_5 : f32 to vector<7x128xf32>
    %7 = arith.maximumf %5, %6 : vector<7x128xf32>
    %c0_6 = arith.constant 0 : index
    %c0_7 = arith.constant 0 : index
    %8 = vector.load %arg3[%c0_6, %c0_7] : memref<5x7xf32, #tpu.memory_space<vmem>>, vector<5x7xf32>
    %cst_8 = arith.constant dense<0.000000e+00> : vector<5x128xf32>
    %9 = tpu.matmul %8, %7, %cst_8 {dimension_numbers = #tpu.dot_dimension_numbers<[1], [0], [0], [1], [0, 0, 1, 1], [], []>, precision = #tpu.contract_precision<fp32>} : vector<5x7xf32>, vector<7x128xf32>, vector<5x128xf32> -> vector<5x128xf32>
    %c0_9 = arith.constant 0 : index
    %c0_10 = arith.constant 0 : index
    %10 = vector.load %arg4[%c0_9, %c0_10] : memref<5x1xf32, #tpu.memory_space<vmem>>, vector<5x1xf32>
    %11 = vector.broadcast %10 : vector<5x1xf32> to vector<5x128xf32>
    %12 = arith.addf %9, %11 : vector<5x128xf32>
    %cst_11 = arith.constant 0.000000e+00 : f32
    %13 = vector.broadcast %cst_11 : f32 to vector<5x128xf32>
    %14 = arith.maximumf %12, %13 : vector<5x128xf32>
    %cst_12 = arith.constant dense<0.000000e+00> : vector<7x128xf32>
    %15 = tpu.matmul %0, %14, %cst_12 {dimension_numbers = #tpu.dot_dimension_numbers<[1], [0], [0], [1], [0, 0, 1, 1], [], []>, precision = #tpu.contract_precision<fp32>} : vector<7x5xf32>, vector<5x128xf32>, vector<7x128xf32> -> vector<7x128xf32>
    %16 = vector.broadcast %1 : vector<7x1xf32> to vector<7x128xf32>
    %17 = arith.addf %15, %16 : vector<7x128xf32>
    %cst_13 = arith.constant 0.000000e+00 : f32
    %18 = vector.broadcast %cst_13 : f32 to vector<7x128xf32>
    %19 = arith.maximumf %17, %18 : vector<7x128xf32>
    %c0_14 = arith.constant 0 : index
    %c0_15 = arith.constant 0 : index
    %20 = vector.load %arg6[%c0_14, %c0_15] : memref<7x128xf32, #tpu.memory_space<vmem>>, vector<7x128xf32>
    tpu.vector_store %arg6[%c0_14, %c0_15], %19 {strides = array<i32>} : memref<7x128xf32, #tpu.memory_space<vmem>>, vector<7x128xf32>,
    return
  }
  func.func @transform_0(%arg0: i32) -> (i32, i32) {
    %c0_i32 = arith.constant 0 : i32
    %c0_i32_0 = arith.constant 0 : i32
    %c0_i32_1 = arith.constant 0 : i32
    return %c0_i32, %c0_i32_0 : i32, i32
  }
  func.func @transform_1(%arg0: i32) -> (i32, i32) {
    %c0_i32 = arith.constant 0 : i32
    %c0_i32_0 = arith.constant 0 : i32
    %c0_i32_1 = arith.constant 0 : i32
    return %c0_i32, %c0_i32_0 : i32, i32
  }
  func.func @transform_2(%arg0: i32) -> (i32, i32) {
    %c0_i32 = arith.constant 0 : i32
    %c0_i32_0 = arith.constant 0 : i32
    %c0_i32_1 = arith.constant 0 : i32
    return %c0_i32, %c0_i32_0 : i32, i32
  }
  func.func @transform_3(%arg0: i32) -> (i32, i32) {
    %c0_i32 = arith.constant 0 : i32
    %c0_i32_0 = arith.constant 0 : i32
    %c0_i32_1 = arith.constant 0 : i32
    return %c0_i32, %c0_i32_0 : i32, i32
  }
  func.func @transform_4(%arg0: i32) -> (i32, i32) {
    %c0_i32 = arith.constant 0 : i32
    %c0_i32_0 = arith.constant 0 : i32
    return %c0_i32, %arg0 : i32, i32
  }
  func.func @transform_5(%arg0: i32) -> (i32, i32) {
    %c0_i32 = arith.constant 0 : i32
    %c0_i32_0 = arith.constant 0 : i32
    return %c0_i32, %arg0 : i32, i32
  }
}

</mosaic_0001>

<bundles_post_ra>
// kernel: tpu_custom_call.1
= control target key start
LH: loop header
LB: loop body
LE: loop exit
PB: predicated region body
PF: predicated region fallthrough
CT: control target
= control target key end

     0   :  { %vm33_vm0 = vcmask 1044480   ;;  %vm29_vm1 = vcmask 39936   ;;  %v1598_v1 = vmov 0.0   ;;  %vm1599_vm2 = vmmov 0   ;;  %s1743_s0 = inlined_call_operand.vmem [shape: f32[7,5], index: 0, kind: input, shape index: {}]   ;;  %s1744_s1 = inlined_call_operand.vmem [shape: f32[7,1], index: 1, kind: input, shape index: {}]   ;;  %s1745_s2 = inlined_call_operand.vmem [shape: f32[5,7], index: 2, kind: input, shape index: {}]   ;;  %s1746_s3 = inlined_call_operand.vmem [shape: f32[5,1], index: 3, kind: input, shape index: {}]   ;;  %s1747_s4 = inlined_call_operand.vmem [shape: f32[5,16], index: 4, kind: input, shape index: {}]   ;;  %s1748_s5 = inlined_call_operand.hbm [shape: f32[7,16], index: 5, kind: output, shape index: {}]  }
   0x1   :  { %v23_v0 = vld [vmem:[%s1747_s4] sm:$0x1f]  ;;  %1462 = vmatprep.subr.mxu0 %v1598_v1  ;;  %1464 = vmatprep.mubr.msk.f32.mxu0 %vm1599_vm2, %v1598_v1 }
   0x2   :  { %v35_v2 = vsel %vm33_vm0, %v23_v0, 0  ;;  %v21_v3 = vld [vmem:[%s1743_s0] sm:$0x7f]  ;;  %1447 = vmatprep.subr.mxu1 %v1598_v1  ;;  %1449 = vmatprep.mubr.msk.f32.mxu1 %vm1599_vm2, %v1598_v1 }
   0x3   :  { %v38_v4 = vand.u32 4294901760, %v35_v2  ;;  %v31_v5 = vsel %vm29_vm1, %v21_v3, 0 }
   0x4   :  { %10 = vsyncpa [#allocation3], 0  ;;  %v1645_v6 = vand.u32 4294901760, %v31_v5  ;;  %v1600_v7 = vmov 0   ;;  %v22_v8 = vld [vmem:[%s1744_s1] sm:$0x7f] }
   0x5   :  { %1573 = vset.pattern.permute.xlu0 %v1600_v7  ;;  %v115_v9 = vsub.f32 %v35_v2, %v38_v4  ;;  %1463 = vmatpush3.msra.mxu0 %v38_v4  ;;  %v485_v14 = vld [vmem:[%s1746_s3] sm:$0x1f]  ;;  %vm491_vm3 = vcmask 56320   ;;  %vm495_vm4 = vcmask 1046528  }
   0x6   :  { %1448 = vmatpush3.msra.mxu1 %v38_v4  ;;  %v1651_v10 = vsub.f32 %v31_v5, %v1645_v6  ;;  %1467 = vmatprep.subr.mxu0 %v1598_v1  ;;  %v484_v18 = vld [vmem:[%s1745_s2] sm:$0x1f]  ;;  %s1601_s2 = smov [#allocation2]  }
   0x7   :  { %1452 = vmatprep.subr.mxu1 %v1598_v1  ;;  %v116_v11 = vand.u32 4294901760, %v115_v9  ;;  %26 = vperm.xlu0 %1573, %v22_v8   ;;  %v493_v19 = vsel %vm491_vm3, %v484_v18, 0  ;;  %s1403_s24 = sshll.u32 %s1601_s2, 4  ;;  %s1404_s24 = int_to_ptr.vmem [resolvable:$true] %s1403_s24 }
   0x8   :  { %v1656_v12 = vand.u32 4294901760, %v1651_v10  ;;  %v565_v20 = vand.u32 4294901760, %v493_v19  ;;  %s1574_s25 = scalar_lea.vmem %s1404_s24, 128  ;;  %p1579_p1 = scmp.lt.s32.totalorder %s1404_s24, %s1404_s24 }
   0x9   :  { %v117_v13 = vsub.f32 %v115_v9, %v116_v11  ;;  %p1575_p0 = scmp.ne.s32.totalorder %s1404_s24, %s1574_s25  ;;  %p1580_p2 = scmp.lt.s32.totalorder %s1574_s25, %s1574_s25 }
   0xa   :  { %1465 = vmatmul.mubr.f32.vlgmr.msra.gmra.mrb[0].mxu0 %v1656_v12  ;;  %v106_v15 = vsub.f32 %v1651_v10, %v1656_v12  ;;  %v566_v21 = vsub.f32 %v493_v19, %v565_v20 }
   0xb   :  { %1468 = vmatpush3.msra.mxu0 %v116_v11  ;;  %1469 = vmatprep.mubr.msk.f32.mxu0 %vm1599_vm2, %v1598_v1  ;;  %v118_v16 = vand.u32 4294901760, %v117_v13  ;;  %p1581_p3 = por %p1580_p2, %p1579_p1 }
   0xc   :  { %v1666_v17 = vand.u32 4294901760, %v106_v15  ;;  %1472 = vmatprep.subr.mxu0 %v1598_v1  ;;  %488 = vperm.xlu0 %1573, %v485_v14   ;;  %v567_v24 = vand.u32 4294901760, %v566_v21 }
   0xd   :  { %p1582_p4 = pnand %p1581_p3, %p1575_p0 }
   0xe   :  { %1450 = vmatmul.mubr.f32.vlgmr.msra.gmra.mrb[0].mxu1 %v1666_v17  ;;  %v568_v30 = vsub.f32 %v566_v21, %v567_v24 }
   0xf   :  { %1453 = vmatpush3.msra.mxu1 %v118_v16  ;;  %1454 = vmatprep.mubr.msk.f32.mxu1 %vm1599_vm2, %v1598_v1 }
  0x10   :  { %1457 = vmatprep.subr.mxu1 %v1598_v1  ;;  %v569_v33 = vand.u32 4294901760, %v568_v30 }
  0x12   :  { %1470 = vmatmul.mubr.f32.vlgmr.msra.gmra.mrb[0].mxu0 %v1645_v6 }
  0x13   :  { %1473 = vmatpush3.msra.mxu0 %v38_v4  ;;  %1474 = vmatprep.mubr.msk.f32.mxu0 %vm1599_vm2, %v1598_v1 }
  0x14   :  { %1507 = vmatprep.subr.mxu0 %v1598_v1 }
  0x16   :  { %1455 = vmatmul.mubr.f32.vlgmr.msra.gmra.mrb[0].mxu1 %v1645_v6 }
  0x17   :  { %1458 = vmatpush3.msra.mxu1 %v115_v9  ;;  %1459 = vmatprep.mubr.msk.f32.mxu1 %vm1599_vm2, %v1598_v1 }
  0x18   :  { %1477 = vmatprep.subr.mxu1 %v1598_v1 }
  0x1a   :  { %1475 = vmatmul.mubr.f32.vlgmr.msra.gmra.mrb[0].mxu0 %v1645_v6 }
  0x1b   :  { %1509 = vmatprep.mubr.msk.f32.mxu0 %vm1599_vm2, %v1598_v1 }
  0x1e   :  { %1460 = vmatmul.mubr.f32.vlgmr.msra.gmra.mrb[0].mxu1 %v1651_v10 }
  0x1f   :  { %1479 = vmatprep.mubr.msk.f32.mxu1 %vm1599_vm2, %v1598_v1 }
  0x86   :  { %v1690_v25 = vpop.permute.xlu0 %26 }
  0x8b   :  { %v489_v39 = vpop.permute.xlu0 %488 }
  0xed   :  { %v479_v22 = vpop.f32.mrb[0].mxu0 }
  0xee   :  { %v1476_v23 = vpop.f32.mrb[1].mxu0 }
  0xf1   :  { %v259_v26 = vpop.f32.mrb[0].mxu1 }
  0xf2   :  { %v1537_v27 = vadd.f32 %v259_v26, %v1690_v25  ;;  %v1461_v28 = vpop.f32.mrb[1].mxu1 }
  0xf4   :  { %v1538_v29 = vadd.f32 %v1537_v27, %v479_v22 }
  0xf6   :  { %v483_v31 = vmax.f32 %v1538_v29, 0.0 }
  0xf8   :  { %v497_v32 = vsel %vm495_vm4, %v483_v31, 0 }
  0xf9   :  { %v500_v34 = vand.u32 4294901760, %v497_v32 }
  0xfb   :  { %v577_v35 = vsub.f32 %v497_v32, %v500_v34  ;;  %1478 = vmatpush3.msra.mxu1 %v500_v34 }
  0xfc   :  { %1480 = vmatmul.mubr.f32.vlgmr.msra.gmra.mrb[2].mxu1 %v569_v33  ;;  %1482 = vmatprep.subr.mxu1 %v1598_v1 }
  0xfd   :  { %v578_v36 = vand.u32 4294901760, %v577_v35  ;;  %1484 = vmatprep.mubr.msk.f32.mxu1 %vm1599_vm2, %v1598_v1 }
  0xff   :  { %v579_v37 = vsub.f32 %v577_v35, %v578_v36 }
 0x101   :  { %v580_v38 = vand.u32 4294901760, %v579_v37 }
 0x103   :  { %1483 = vmatpush3.msra.mxu1 %v580_v38 }
 0x104   :  { %1485 = vmatmul.mubr.f32.vlgmr.msra.gmra.mrb[2].mxu1 %v565_v20  ;;  %1487 = vmatprep.subr.mxu1 %v1598_v1 }
 0x105   :  { %1488 = vmatpush3.msra.mxu1 %v577_v35  ;;  %1489 = vmatprep.mubr.msk.f32.mxu1 %vm1599_vm2, %v1598_v1 }
 0x106   :  { %1492 = vmatprep.subr.mxu1 %v1598_v1 }
 0x10c   :  { %1490 = vmatmul.mubr.f32.vlgmr.msra.gmra.mrb[2].mxu1 %v566_v21 }
 0x10d   :  { %1493 = vmatpush3.msra.mxu1 %v500_v34  ;;  %1494 = vmatprep.mubr.msk.f32.mxu1 %vm1599_vm2, %v1598_v1 }
 0x10e   :  { %1497 = vmatprep.subr.mxu1 %v1598_v1 }
 0x114   :  { %1495 = vmatmul.mubr.f32.vlgmr.msra.gmra.mrb[2].mxu1 %v567_v24 }
 0x115   :  { %1498 = vmatpush3.msra.mxu1 %v578_v36  ;;  %1499 = vmatprep.mubr.msk.f32.mxu1 %vm1599_vm2, %v1598_v1 }
 0x116   :  { %1502 = vmatprep.subr.mxu1 %v1598_v1 }
 0x11c   :  { %1500 = vmatmul.mubr.f32.vlgmr.msra.gmra.mrb[2].mxu1 %v565_v20 }
 0x11d   :  { %1503 = vmatpush3.msra.mxu1 %v500_v34  ;;  %1504 = vmatprep.mubr.msk.f32.mxu1 %vm1599_vm2, %v1598_v1 }
 0x124   :  { %1505 = vmatmul.mubr.f32.vlgmr.msra.gmra.mrb[2].mxu1 %v565_v20 }
 0x1f7   :  { %v941_v40 = vpop.f32.mrb[2].mxu1 }
 0x1f8   :  { %v1539_v41 = vadd.f32 %v941_v40, %v489_v39  ;;  %v1506_v42 = vpop.f32.mrb[3].mxu1 }
 0x1fa   :  { %v945_v43 = vmax.f32 %v1539_v41, 0.0 }
 0x1fc   :  { %v947_v44 = vsel %vm33_vm0, %v945_v43, 0 }
 0x1fd   :  { %v950_v45 = vand.u32 4294901760, %v947_v44 }
 0x1ff   :  { %v1027_v46 = vsub.f32 %v947_v44, %v950_v45  ;;  %1508 = vmatpush3.msra.mxu0 %v950_v45 }
 0x200   :  { %1510 = vmatmul.mubr.f32.vlgmr.msra.gmra.mrb[2].mxu0 %v1666_v17  ;;  %1512 = vmatprep.subr.mxu0 %v1598_v1 }
 0x201   :  { %v1028_v47 = vand.u32 4294901760, %v1027_v46  ;;  %1514 = vmatprep.mubr.msk.f32.mxu0 %vm1599_vm2, %v1598_v1 }
 0x203   :  { %v1029_v48 = vsub.f32 %v1027_v46, %v1028_v47 }
 0x205   :  { %v1030_v49 = vand.u32 4294901760, %v1029_v48 }
 0x207   :  { %1513 = vmatpush3.msra.mxu0 %v1030_v49 }
 0x208   :  { %1515 = vmatmul.mubr.f32.vlgmr.msra.gmra.mrb[2].mxu0 %v1645_v6  ;;  %1517 = vmatprep.subr.mxu0 %v1598_v1 }
 0x209   :  { %1518 = vmatpush3.msra.mxu0 %v1027_v46  ;;  %1519 = vmatprep.mubr.msk.f32.mxu0 %vm1599_vm2, %v1598_v1 }
 0x20a   :  { %1522 = vmatprep.subr.mxu0 %v1598_v1 }
 0x210   :  { %1520 = vmatmul.mubr.f32.vlgmr.msra.gmra.mrb[2].mxu0 %v1651_v10 }
 0x211   :  { %1523 = vmatpush3.msra.mxu0 %v950_v45  ;;  %1524 = vmatprep.mubr.msk.f32.mxu0 %vm1599_vm2, %v1598_v1 }
 0x212   :  { %1527 = vmatprep.subr.mxu0 %v1598_v1 }
 0x218   :  { %1525 = vmatmul.mubr.f32.vlgmr.msra.gmra.mrb[2].mxu0 %v1656_v12 }
 0x219   :  { %1528 = vmatpush3.msra.mxu0 %v1028_v47  ;;  %1529 = vmatprep.mubr.msk.f32.mxu0 %vm1599_vm2, %v1598_v1 }
 0x21a   :  { %1532 = vmatprep.subr.mxu0 %v1598_v1 }
 0x220   :  { %1530 = vmatmul.mubr.f32.vlgmr.msra.gmra.mrb[2].mxu0 %v1645_v6 }
 0x221   :  { %1533 = vmatpush3.msra.mxu0 %v950_v45  ;;  %1534 = vmatprep.mubr.msk.f32.mxu0 %vm1599_vm2, %v1598_v1 }
 0x228   :  { %1535 = vmatmul.mubr.f32.vlgmr.msra.gmra.mrb[2].mxu0 %v1645_v6 }
 0x2fb   :  { %v1391_v50 = vpop.f32.mrb[2].mxu0 }
 0x2fc   :  { %v1540_v51 = vadd.f32 %v1391_v50, %v1690_v25  ;;  %v1536_v52 = vpop.f32.mrb[3].mxu0 }
 0x2fe   :  { %v1395_v53 = vmax.f32 %v1540_v51, 0.0 }
 0x300   :  { %1396 = vst [vmem:[#allocation2] sm:$0x7f] %v1395_v53 }
 0x301   :  { %1585 = shalt.err (!%p1582_p4)
}
 0x302   :  { %s1586_s28 = scalar_lea.hbm %s1748_s5, 128 }
 0x303   :  { %p1587_p5 = scmp.ne.s32.totalorder %s1748_s5, %s1586_s28  ;;  %p1590_p6 = scmp.lt.u32.totalorder %s1586_s28, %s1748_s5 }
 0x305   :  { %p1592_p7 = pnand %p1590_p6, %p1587_p5 }
 0x307   :  { %1595 = shalt.err (!%p1592_p7)
}
 0x308   :  { %1406 = dma.vmem_to_hbm [thread:$0]  %s1404_s24, 128, %s1748_s5, [#allocation3]  }
 0x309   :  { %1596 = dma.done.wait [#allocation3], 128  }
 0x30a   :  { %1597 = vsyncadd [#allocation3], 4294967168 }
 0x30b   :  { %1410 = vsyncpa [#allocation3], 1 }

</bundles_post_ra>
